<compile_context>
chip_gen: v7x
topology: tpu7x:2x2x1
jax: 0.10.0
libtpu: 0.0.40
codegen_flags: <defaults>
</compile_context>

<pallas_src>
import jax
import jax.numpy as jnp
from jax.experimental import pallas as pl
from jax.experimental.pallas import tpu as pltpu

_MIB = 1024 * 1024


def _make_pointwise_conv_kernel(apply_sigmoid: bool):
    def kernel(x_ref, w_ref, o_ref):
        # x_ref: (nb, C_in, T)  nb batch rows folded into the block, channels
        #                       in sublanes, spatial tile in lanes.
        # w_ref: (C_out, C_in)  full weight, resident across the grid.
        # o_ref: (nb, C_out, T) lane-dense output tile.
        w = w_ref[...]
        nb = x_ref.shape[0]
        for b in range(nb):  # static, tiny (N is small at inference)
            # Channel contraction on the MXU: keeps the VALU and the single
            # store slot free; hides under the HBM DMA even at <1% MXU util.
            acc = jnp.dot(w, x_ref[b], preferred_element_type=jnp.float32)
            if apply_sigmoid:
                # exp and approx reciprocal both run in the (otherwise idle)
                # EUP slot; avoids a multi-op exact f32 divide on the VALU.
                acc = pl.reciprocal(1.0 + jnp.exp(-acc), approx=True)
            o_ref[b] = acc.astype(o_ref.dtype)

    return kernel


def _vmem_budget_bytes():
    """Generation-aware (per-block budget, vmem_limit) in bytes."""
    vmem_cap = None
    get_info = getattr(pltpu, "get_tpu_info", None)
    if get_info is not None:
        try:
            vmem_cap = getattr(get_info(), "vmem_capacity_bytes", None)
        except Exception:  # pragma: no cover - be robust across jax versions
            vmem_cap = None
    if vmem_cap is None or vmem_cap <= 64 * _MIB:
        # v7x (64 MiB per TensorCore) or unknown hardware: stay conservative.
        return 40 * _MIB, 48 * _MIB
    # v5e / v6e: 128 MiB physical VMEM.
    return 96 * _MIB, 112 * _MIB


def outconv_forward(x_nchw, weight, *, fuse_sigmoid=False, max_hw_tile=32768,
                    fold_batch=None):
    """1x1 conv (bias=False) on NCHW input, optional fused sigmoid.

    x_nchw: (N, C_in, H, W)
    weight: (C_out, C_in) or (C_out, C_in, 1, 1)  (nn.Conv2d weight)
    returns: (N, C_out, H, W), dtype matches the input (accumulation is f32).
    """
    N, C_in, H, W = x_nchw.shape
    if weight.ndim == 4:
        weight = weight.reshape(weight.shape[0], weight.shape[1])
    C_out = weight.shape[0]
    assert weight.shape[1] == C_in

    HW = H * W
    x_flat = x_nchw.reshape(N, C_in, HW)  # free reshape for contiguous NCHW

    itemsize = jnp.dtype(x_nchw.dtype).itemsize
    budget_bytes, vmem_limit_bytes = _vmem_budget_bytes()

    def lane_budget(nb):
        # Double-buffered input + output blocks with nb batch rows per block.
        per_lane = 2 * nb * (C_in + C_out) * itemsize
        return max((budget_bytes // per_lane) // 128 * 128, 128)

    if fold_batch is None:
        # Fold the batch into the block when doing so still leaves a healthy
        # lane-dense spatial tile; otherwise batch gets its own grid axis.
        fold_batch = lane_budget(N) >= 512

    nb = N if fold_batch else 1
    hw_cap = min(max(int(max_hw_tile) // 128 * 128, 128), lane_budget(nb))
    if HW <= hw_cap:
        hw_tile, n_hw_tiles = HW, 1  # full extent is always a legal block dim
    else:
        hw_tile, n_hw_tiles = hw_cap, pl.cdiv(HW, hw_cap)

    cost = pl.CostEstimate(
        flops=2 * N * HW * C_in * C_out,
        transcendentals=(N * HW * C_out) if fuse_sigmoid else 0,
        bytes_accessed=itemsize * (N * HW * C_in + N * HW * C_out + C_out * C_in),
    )

    kernel = _make_pointwise_conv_kernel(fuse_sigmoid)

    if fold_batch:
        grid = (n_hw_tiles,)
        in_specs = [
            pl.BlockSpec((N, C_in, hw_tile), lambda t: (0, 0, t)),
            pl.BlockSpec((C_out, C_in), lambda t: (0, 0)),
        ]
        out_specs = pl.BlockSpec((N, C_out, hw_tile), lambda t: (0, 0, t))
        dim_sem = ("parallel",)
    else:
        # Spatial axis leads so v7x's two TensorCores shard useful work even
        # when N == 1; no effect on single-core v5e/v6e.
        grid = (n_hw_tiles, N)
        in_specs = [
            pl.BlockSpec((1, C_in, hw_tile), lambda t, n: (n, 0, t)),
            pl.BlockSpec((C_out, C_in), lambda t, n: (0, 0)),
        ]
        out_specs = pl.BlockSpec((1, C_out, hw_tile), lambda t, n: (n, 0, t))
        dim_sem = ("parallel", "parallel")

    y_flat = pl.pallas_call(
        kernel,
        out_shape=jax.ShapeDtypeStruct((N, C_out, HW), x_nchw.dtype),
        grid_spec=pltpu.PrefetchScalarGridSpec(
            num_scalar_prefetch=0,
            grid=grid,
            in_specs=in_specs,
            out_specs=out_specs,
        ),
        compiler_params=pltpu.CompilerParams(
            dimension_semantics=dim_sem,
            vmem_limit_bytes=vmem_limit_bytes,
        ),
        cost_estimate=cost,
    )(x_flat, weight)

    return y_flat.reshape(N, C_out, H, W)


if __name__ == "__main__":
    key = jax.random.PRNGKey(0)
    kx, kw, kx2, kw2 = jax.random.split(key, 4)

    # --- Case 1: toy output head (batch=2, in_ch=4, n_classes=8, 16x16). ---
    N, C_in, C_out, H, W = 2, 4, 8, 16, 16
    x = jax.random.normal(kx, (N, C_in, H, W), dtype=jnp.float32)
    weight = jax.random.normal(kw, (C_out, C_in), dtype=jnp.float32) * 0.1
    y_ref = jnp.einsum("nchw,oc->nohw", x, weight)

    y = outconv_forward(x, weight)
    jax.block_until_ready(y)
    assert y.shape == (N, C_out, H, W)
    assert jnp.allclose(y, y_ref, atol=1e-5, rtol=1e-5)

    # Fused sigmoid (approx EUP reciprocal -> looser tolerance).
    y_sig = outconv_forward(x, weight, fuse_sigmoid=True)
    jax.block_until_ready(y_sig)
    assert jnp.allclose(y_sig, jax.nn.sigmoid(y_ref), atol=1e-2)

    # Exercise the non-folded (2-D grid, spatial-leading) path.
    y_nf = outconv_forward(x, weight, fold_batch=False)
    jax.block_until_ready(y_nf)
    assert jnp.allclose(y_nf, y_ref, atol=1e-5, rtol=1e-5)

    # --- Case 2: real UNet head channel count (C_in=64), forced tiling. ---
    N2, C_in2, C_out2, H2, W2 = 1, 64, 3, 32, 32
    x2 = jax.random.normal(kx2, (N2, C_in2, H2, W2), dtype=jnp.float32)
    w2 = jax.random.normal(kw2, (C_out2, C_in2, 1, 1), dtype=jnp.float32) * 0.05
    y2_ref = jnp.einsum("nchw,oc->nohw", x2, w2[:, :, 0, 0])
    y2 = outconv_forward(x2, w2, max_hw_tile=512)  # HW=1024 -> 2 spatial tiles
    jax.block_until_ready(y2)
    assert jnp.allclose(y2, y2_ref, atol=1e-4, rtol=1e-4)

    # --- Case 3: bf16 I/O (HBM-bound kernel -> halve bytes), f32 accumulate.
    xb = x.astype(jnp.bfloat16)
    wb = weight.astype(jnp.bfloat16)
    yb = outconv_forward(xb, wb, fuse_sigmoid=True)
    jax.block_until_ready(yb)
    yb_ref = jax.nn.sigmoid(
        jnp.einsum("nchw,oc->nohw", xb.astype(jnp.float32), wb.astype(jnp.float32))
    )
    assert yb.dtype == jnp.bfloat16
    assert jnp.allclose(yb.astype(jnp.float32), yb_ref, atol=2e-2)

    print("KERNEL_OK")
</pallas_src>

<mosaic_0001>
module attributes {stable_mosaic.version = 11 : i64} {
  func.func @kernel(%arg0: i32, %arg1: memref<2x4x256xf32, #tpu.memory_space<vmem>>, %arg2: memref<8x4xf32, #tpu.memory_space<vmem>>, %arg3: memref<2x8x256xf32, #tpu.memory_space<vmem>>) attributes {dimension_semantics = [#tpu.dimension_semantics<parallel>], iteration_bounds = array<i64: 1>, scalar_prefetch = 0 : i64, scratch_operands = 0 : i64, tpu.core_type = #tpu.core_type<tc>, window_params = [{transform_indices = @transform_0, window_bounds = array<i64: 2, 4, 256>}, {pipeline_mode = #tpu.pipeline_mode<synchronous>, transform_indices = @transform_1, window_bounds = array<i64: 8, 4>}, {transform_indices = @transform_2, window_bounds = array<i64: 2, 8, 256>}]} {
    %c0 = arith.constant 0 : index
    %c0_0 = arith.constant 0 : index
    %0 = vector.load %arg2[%c0, %c0_0] : memref<8x4xf32, #tpu.memory_space<vmem>>, vector<8x4xf32>
    %c0_1 = arith.constant 0 : index
    %c0_2 = arith.constant 0 : index
    %c0_3 = arith.constant 0 : index
    %1 = vector.load %arg1[%c0_1, %c0_2, %c0_3] : memref<2x4x256xf32, #tpu.memory_space<vmem>>, vector<1x4x256xf32>
    %2 = vector.shape_cast %1 : vector<1x4x256xf32> to vector<4x256xf32>
    %cst = arith.constant dense<0.000000e+00> : vector<8x256xf32>
    %3 = tpu.matmul %0, %2, %cst {dimension_numbers = #tpu.dot_dimension_numbers<[1], [0], [0], [1], [0, 0, 1, 1], [], []>} : vector<8x4xf32>, vector<4x256xf32>, vector<8x256xf32> -> vector<8x256xf32>
    %c0_4 = arith.constant 0 : index
    %c0_5 = arith.constant 0 : index
    %c0_6 = arith.constant 0 : index
    %4 = vector.load %arg3[%c0_4, %c0_5, %c0_6] : memref<2x8x256xf32, #tpu.memory_space<vmem>>, vector<1x8x256xf32>
    %5 = vector.shape_cast %4 : vector<1x8x256xf32> to vector<8x256xf32>
    %6 = vector.shape_cast %3 : vector<8x256xf32> to vector<1x8x256xf32>
    tpu.vector_store %arg3[%c0_4, %c0_5, %c0_6], %6 {strides = array<i32>} : memref<2x8x256xf32, #tpu.memory_space<vmem>>, vector<1x8x256xf32>,
    %c1 = arith.constant 1 : index
    %c0_7 = arith.constant 0 : index
    %c0_8 = arith.constant 0 : index
    %7 = vector.load %arg1[%c1, %c0_7, %c0_8] : memref<2x4x256xf32, #tpu.memory_space<vmem>>, vector<1x4x256xf32>
    %8 = vector.shape_cast %7 : vector<1x4x256xf32> to vector<4x256xf32>
    %cst_9 = arith.constant dense<0.000000e+00> : vector<8x256xf32>
    %9 = tpu.matmul %0, %8, %cst_9 {dimension_numbers = #tpu.dot_dimension_numbers<[1], [0], [0], [1], [0, 0, 1, 1], [], []>} : vector<8x4xf32>, vector<4x256xf32>, vector<8x256xf32> -> vector<8x256xf32>
    %c1_10 = arith.constant 1 : index
    %c0_11 = arith.constant 0 : index
    %c0_12 = arith.constant 0 : index
    %10 = vector.load %arg3[%c1_10, %c0_11, %c0_12] : memref<2x8x256xf32, #tpu.memory_space<vmem>>, vector<1x8x256xf32>
    %11 = vector.shape_cast %10 : vector<1x8x256xf32> to vector<8x256xf32>
    %12 = vector.shape_cast %9 : vector<8x256xf32> to vector<1x8x256xf32>
    tpu.vector_store %arg3[%c1_10, %c0_11, %c0_12], %12 {strides = array<i32>} : memref<2x8x256xf32, #tpu.memory_space<vmem>>, vector<1x8x256xf32>,
    return
  }
  func.func @transform_0(%arg0: i32) -> (i32, i32, i32) {
    %c0_i32 = arith.constant 0 : i32
    %c0_i32_0 = arith.constant 0 : i32
    %c0_i32_1 = arith.constant 0 : i32
    return %c0_i32, %c0_i32_0, %arg0 : i32, i32, i32
  }
  func.func @transform_1(%arg0: i32) -> (i32, i32) {
    %c0_i32 = arith.constant 0 : i32
    %c0_i32_0 = arith.constant 0 : i32
    %c0_i32_1 = arith.constant 0 : i32
    return %c0_i32, %c0_i32_0 : i32, i32
  }
  func.func @transform_2(%arg0: i32) -> (i32, i32, i32) {
    %c0_i32 = arith.constant 0 : i32
    %c0_i32_0 = arith.constant 0 : i32
    %c0_i32_1 = arith.constant 0 : i32
    return %c0_i32, %c0_i32_0, %arg0 : i32, i32, i32
  }
}

</mosaic_0001>

<bundles_post_ra>
// kernel: tpu_custom_call.1
= control target key start
LH: loop header
LB: loop body
LE: loop exit
PB: predicated region body
PF: predicated region fallthrough
CT: control target
= control target key end

     0   :  { %7 = vsyncpa [#allocation3], 0  ;;  %s323_s0 = inlined_call_operand.hbm [shape: f32[2,4,256], index: 0, kind: input, shape index: {}]   ;;  %s324_s1 = inlined_call_operand.vmem [shape: f32[8,4], index: 1, kind: input, shape index: {}]   ;;  %s325_s2 = inlined_call_operand.hbm [shape: f32[2,8,256], index: 2, kind: output, shape index: {}]  }
   0x1   :  { %8 = vsyncpa [#allocation4], 0  ;;  %s274_s9 = smov [#allocation2]   ;;  %s226_s13 = scalar_lea.hbm %s323_s0, 256 }
   0x2   :  { %s14_s10 = sshll.u32 %s274_s9, 4  ;;  %p227_p0 = scmp.ne.s32.totalorder %s323_s0, %s226_s13  ;;  %s15_s10 = int_to_ptr.vmem [resolvable:$true] %s14_s10 }
   0x3   :  { %p230_p1 = scmp.lt.u32.totalorder %s226_s13, %s323_s0 }
   0x5   :  { %p232_p2 = pnand %p230_p1, %p227_p0 }
   0x7   :  { %235 = shalt.err (!%p232_p2)
}
   0x8   :  { %s236_s18 = scalar_lea.vmem %s15_s10, 256  ;;  %p241_p4 = scmp.lt.s32.totalorder %s15_s10, %s15_s10 }
   0x9   :  { %p237_p3 = scmp.ne.s32.totalorder %s15_s10, %s236_s18  ;;  %p242_p5 = scmp.lt.s32.totalorder %s236_s18, %s236_s18 }
   0xb   :  { %p243_p6 = por %p242_p5, %p241_p4 }
   0xd   :  { %p244_p7 = pnand %p243_p6, %p237_p3 }
   0xf   :  { %247 = shalt.err (!%p244_p7)
}
  0x10   :  { %s275_s19 = smov 128   ;;  %s276_s20 = smov 8  }
  0x11   :  { %20 = dma.hbm_to_vmem [thread:$0]  %s323_s0, 256, %s15_s10, [#allocation3], %s275_s19, %s275_s19, %s276_s20  }
  0x12   :  { %270 = dma.done.wait [#allocation3], 256  }
  0x13   :  { %271 = vsyncadd [#allocation3], 4294967040  ;;  %v277_v0 = vmov 0.0   ;;  %v27_v1 = vld [vmem:[#allocation2] sm:$0xff]  ;;  %vm34_vm0 = vcmask 1043456   ;;  %v113_v2 = vld [vmem:[#allocation2 + $0x8] sm:$0xff] }
  0x14   :  { %103 = vmatprep.mubr.f32.mxu0 %v277_v0  ;;  %184 = vmatprep.mubr.f32.mxu1 %v277_v0  ;;  %v29_v3 = vcombine.high %v27_v1, %v27_v1  ;;  %v115_v4 = vcombine.high %v113_v2, %v113_v2  ;;  %v26_v5 = vld [vmem:[%s324_s1] sm:$0xff]  ;;  %vm30_vm1 = vcmask 31744   ;;  %s278_s0 = smov [#allocation5]  }
  0x15   :  { %s199_s25 = sshll.u32 %s278_s0, 4  ;;  %s200_s25 = int_to_ptr.vmem [resolvable:$true] %s199_s25 }
  0x16   :  { %211 = vmatprep.subr.msk.mxu0 %vm34_vm0, %v29_v3  ;;  %214 = vmatprep.subr.msk.mxu1 %vm34_vm0, %v115_v4  ;;  %s248_s26 = scalar_lea.vmem %s200_s25, 512  ;;  %p253_p9 = scmp.lt.s32.totalorder %s200_s25, %s200_s25 }
  0x17   :  { %212 = vmatpush1.msk.msra.mxu0 %vm34_vm0, %v27_v1  ;;  %215 = vmatpush1.msk.msra.mxu1 %vm34_vm0, %v113_v2  ;;  %p249_p8 = scmp.ne.s32.totalorder %s200_s25, %s248_s26  ;;  %p254_p10 = scmp.lt.s32.totalorder %s248_s26, %s248_s26 }
  0x18   :  { %213 = vmatmul.mubr.msk.f32.vlgmr.msra.gmra.mrb[0].mxu0 %vm30_vm1, %v26_v5  ;;  %216 = vmatmul.mubr.msk.f32.vlgmr.msra.gmra.mrb[0].mxu1 %vm30_vm1, %v26_v5 }
  0x19   :  { %p255_p11 = por %p254_p10, %p253_p9 }
  0x1b   :  { %p256_p12 = pnand %p255_p11, %p249_p8 }
  0xeb   :  { %v105_v6 = vpop.f32.mrb[0].mxu0  ;;  %v186_v7 = vpop.f32.mrb[0].mxu1 }
  0xec   :  { %110 = vst [vmem:[#allocation5] sm:$0xff] %v105_v6  ;;  %192 = vst [vmem:[#allocation5 + $0x10] sm:$0xff] %v186_v7  ;;  %v107_v8 = vpop.f32.mrb[1].mxu0  ;;  %v188_v9 = vpop.f32.mrb[1].mxu1 }
  0xed   :  { %111 = vst [vmem:[#allocation5 + $0x8] sm:$0xff] %v107_v8  ;;  %193 = vst [vmem:[#allocation5 + $0x18] sm:$0xff] %v188_v9 }
  0xee   :  { %259 = shalt.err (!%p256_p12)
}
  0xef   :  { %s260_s28 = scalar_lea.hbm %s325_s2, 512 }
  0xf0   :  { %p261_p13 = scmp.ne.s32.totalorder %s325_s2, %s260_s28  ;;  %p264_p0 = scmp.lt.u32.totalorder %s260_s28, %s325_s2 }
  0xf2   :  { %p266_p1 = pnand %p264_p0, %p261_p13 }
  0xf4   :  { %269 = shalt.err (!%p266_p1)
}
  0xf5   :  { %s279_s5 = smov 256   ;;  %s280_s6 = smov 16  }
  0xf6   :  { %205 = dma.vmem_to_hbm [thread:$0]  %s200_s25, 512, %s325_s2, [#allocation4], %s279_s5, %s279_s5, %s280_s6  }
  0xf7   :  { %272 = dma.done.wait [#allocation4], 512  }
  0xf8   :  { %273 = vsyncadd [#allocation4], 4294966784 }
  0xf9   :  { %209 = vsyncpa [#allocation3], 1 }
  0xfa   :  { %210 = vsyncpa [#allocation4], 1 }

</bundles_post_ra>
